<compile_context>
chip_gen: v6e
topology: v6e:2x2x1
jax: 0.10.0
libtpu: 0.0.40
codegen_flags: <defaults>
</compile_context>

<pallas_src>
import functools
import math

import numpy as np

import jax
import jax.numpy as jnp
from jax.experimental import pallas as pl
from jax.experimental.pallas import tpu as pltpu

EPS = 1e-5

# ----------------------------------------------------------------------------
# One-time probe of pltpu.roll's rotation convention on the target TPU.
# ----------------------------------------------------------------------------
_ROLL_NUMPY = None


def _roll_matches_numpy():
    """True iff pltpu.roll(x, s)[i] == x[i - s] (np.roll convention)."""
    m = 128
    x = jnp.broadcast_to(jnp.arange(m, dtype=jnp.float32), (8, m))

    def k(x_ref, o_ref):
        o_ref[...] = pltpu.roll(x_ref[...], 1, 1)

    y = pl.pallas_call(
        k, out_shape=jax.ShapeDtypeStruct((8, m), jnp.float32))(x)
    return float(y[0, 0]) == float(m - 1)


def _get_roll_convention():
    global _ROLL_NUMPY
    if _ROLL_NUMPY is None:
        _ROLL_NUMPY = _roll_matches_numpy()
    return _ROLL_NUMPY


# ----------------------------------------------------------------------------
# Static per-tap lane shifts and {0,1} validity masks for a 3x3 SAME conv over
# activations flattened as m = (n*H + h)*W + w.
# ----------------------------------------------------------------------------
def _tap_shifts_and_masks(N, H, W, roll_is_numpy):
    M = N * H * W
    m = np.arange(M)
    h = (m // W) % H
    w = m % W
    shifts, masks = [], []
    for dy in range(3):
        for dx in range(3):
            oy, ox = dy - 1, dx - 1
            s = oy * W + ox                     # want tap[:, m] = A[:, m + s]
            amt = (-s) % M if roll_is_numpy else s % M
            shifts.append(int(amt))
            valid = (h + oy >= 0) & (h + oy < H) & (w + ox >= 0) & (w + ox < W)
            masks.append(valid.astype(np.float32))
    return tuple(shifts), jnp.asarray(np.stack(masks))       # (9, M)


# ----------------------------------------------------------------------------
# Kernel
# ----------------------------------------------------------------------------
def resblock_kernel(x_ref, mask_ref, w1_ref, g1_ref, be1_ref,
                    w2_ref, g2_ref, be2_ref, o_ref, *, shifts):
    """x_ref/o_ref: (C, M); mask_ref: (9, M); w*: (C, 9C); g*/be*: (C, 1)."""
    x = x_ref[...]                                            # (C, M) f32

    def conv3x3(a, w_ref):
        # Build the (9C, M) im2col patch: 9 lane rotations (XLU) of (C, M),
        # each masked for the SAME-padding halo, stacked along sublanes
        # (tile-aligned concat), then ONE MXU matmul (C, 9C) @ (9C, M).
        taps = []
        for t, amt in enumerate(shifts):
            shifted = pltpu.roll(a, amt, 1) if amt else a
            taps.append(shifted * mask_ref[t:t + 1, :])
        patch = jnp.concatenate(taps, axis=0)                 # (9C, M)
        return jnp.dot(w_ref[...], patch,
                       preferred_element_type=jnp.float32)    # (C, M)

    def bn_affine(y, g_ref, be_ref):
        # Batch-statistics BN folded to a single multiply-add:
        #   scale = g / sqrt(var + eps),  shift = be - mean * scale
        mean = jnp.mean(y, axis=1, keepdims=True)                  # (C, 1)
        var = jnp.mean((y - mean) ** 2, axis=1, keepdims=True)     # biased var
        scale = g_ref[...] * jax.lax.rsqrt(var + EPS)
        shift = be_ref[...] - mean * scale
        return scale, shift

    # conv1 -> bn1 -> relu
    y1 = conv3x3(x, w1_ref)
    s1, t1 = bn_affine(y1, g1_ref, be1_ref)
    y1 = jnp.maximum(y1 * s1 + t1, 0.0)

    # conv2 -> bn2 -> (+residual) -> relu, fused into one elementwise pass
    y2 = conv3x3(y1, w2_ref)
    s2, t2 = bn_affine(y2, g2_ref, be2_ref)
    o_ref[...] = jnp.maximum(y2 * s2 + t2 + x, 0.0)


# ----------------------------------------------------------------------------
# Wrapper
# ----------------------------------------------------------------------------
def resblock_pallas(x_nchw, params):
    """x_nchw: (N, C, H, W) float32 (PyTorch layout).  Returns (N, C, H, W)."""
    x_nchw = x_nchw.astype(jnp.float32)
    N, C, H, W = x_nchw.shape
    M = N * H * W

    shifts, masks = _tap_shifts_and_masks(N, H, W, _get_roll_convention())

    # Channels on sublanes, flattened (n, h, w) positions on lanes.
    x_cm = jnp.transpose(x_nchw, (1, 0, 2, 3)).reshape(C, M)

    # (Cout, Cin, 3, 3) -> (Cout, 9*Cin), K ordered tap-major to match patch.
    fold = lambda w: jnp.transpose(w, (0, 2, 3, 1)).reshape(C, 9 * C)
    w1, w2 = fold(params["w1"]), fold(params["w2"])
    g1, be1 = params["g1"].reshape(C, 1), params["be1"].reshape(C, 1)
    g2, be2 = params["g2"].reshape(C, 1), params["be2"].reshape(C, 1)
    # Conv biases b1/b2 are intentionally NOT passed to the kernel: with
    # batch-statistics BN they are exactly cancelled by the mean subtraction.

    full = lambda shape: pl.BlockSpec(shape, lambda i: (0,) * len(shape))

    out_cm = pl.pallas_call(
        functools.partial(resblock_kernel, shifts=shifts),
        out_shape=jax.ShapeDtypeStruct((C, M), jnp.float32),
        grid=(1,),
        in_specs=[
            full((C, M)),                                    # x (and residual)
            full((9, M)),                                    # tap masks
            full((C, 9 * C)), full((C, 1)), full((C, 1)),    # conv1 / bn1
            full((C, 9 * C)), full((C, 1)), full((C, 1)),    # conv2 / bn2
        ],
        out_specs=full((C, M)),
        compiler_params=pltpu.CompilerParams(
            dimension_semantics=("arbitrary",)),
    )(x_cm, masks, w1, g1, be1, w2, g2, be2)

    return jnp.transpose(out_cm.reshape(C, N, H, W), (1, 0, 2, 3))


# ----------------------------------------------------------------------------
# Pure-JAX reference (NCHW), mirrors the PyTorch forward (including conv bias).
# ----------------------------------------------------------------------------
def resblock_reference(x, p):
    def conv(x, w, b):
        y = jax.lax.conv_general_dilated(
            x, w, window_strides=(1, 1), padding="SAME",
            dimension_numbers=("NCHW", "OIHW", "NCHW"))
        return y + b[None, :, None, None]

    def bn(y, g, be):
        mean = jnp.mean(y, axis=(0, 2, 3), keepdims=True)
        var = jnp.mean((y - mean) ** 2, axis=(0, 2, 3), keepdims=True)
        return ((y - mean) / jnp.sqrt(var + EPS)
                * g[None, :, None, None] + be[None, :, None, None])

    y = jax.nn.relu(bn(conv(x, p["w1"], p["b1"]), p["g1"], p["be1"]))
    y = bn(conv(y, p["w2"], p["b2"]), p["g2"], p["be2"])
    return jax.nn.relu(y + x)


if __name__ == "__main__":
    num_hidden = 16
    N, H, W = 2, 8, 8

    key = jax.random.PRNGKey(0)
    ks = jax.random.split(key, 9)
    wscale = 1.0 / math.sqrt(num_hidden * 9)

    x = jax.random.normal(ks[0], (N, num_hidden, H, W), jnp.float32)
    params = {
        "w1": jax.random.normal(ks[1], (num_hidden, num_hidden, 3, 3), jnp.float32) * wscale,
        "b1": jax.random.normal(ks[2], (num_hidden,), jnp.float32) * 0.1,
        "g1": 1.0 + 0.1 * jax.random.normal(ks[3], (num_hidden,), jnp.float32),
        "be1": 0.1 * jax.random.normal(ks[4], (num_hidden,), jnp.float32),
        "w2": jax.random.normal(ks[5], (num_hidden, num_hidden, 3, 3), jnp.float32) * wscale,
        "b2": jax.random.normal(ks[6], (num_hidden,), jnp.float32) * 0.1,
        "g2": 1.0 + 0.1 * jax.random.normal(ks[7], (num_hidden,), jnp.float32),
        "be2": 0.1 * jax.random.normal(ks[8], (num_hidden,), jnp.float32),
    }

    out = jax.block_until_ready(resblock_pallas(x, params))
    ref = jax.block_until_ready(resblock_reference(x, params))

    assert out.shape == x.shape and out.dtype == jnp.float32
    max_err = float(jnp.max(jnp.abs(out - ref)))
    assert jnp.allclose(out, ref, rtol=1e-3, atol=1e-3), max_err
    print("KERNEL_OK")
</pallas_src>

<mosaic_0001>
module attributes {stable_mosaic.version = 11 : i64} {
  func.func @k(%arg0: memref<8x128xf32, #tpu.memory_space<vmem>>, %arg1: memref<8x128xf32, #tpu.memory_space<vmem>>) attributes {dimension_semantics = [], scalar_prefetch = 0 : i64, scratch_operands = 0 : i64, tpu.core_type = #tpu.core_type<tc>} {
    %c0 = arith.constant 0 : index
    %c0_0 = arith.constant 0 : index
    %0 = vector.load %arg0[%c0, %c0_0] : memref<8x128xf32, #tpu.memory_space<vmem>>, vector<8x128xf32>
    %c1_i32 = arith.constant 1 : i32
    %1 = tpu.dynamic_rotate %0 by %c1_i32 dim 1 : vector<8x128xf32>, i32 -> vector<8x128xf32>
    %c0_1 = arith.constant 0 : index
    %c0_2 = arith.constant 0 : index
    %2 = vector.load %arg1[%c0_1, %c0_2] : memref<8x128xf32, #tpu.memory_space<vmem>>, vector<8x128xf32>
    tpu.vector_store %arg1[%c0_1, %c0_2], %1 {strides = array<i32>} : memref<8x128xf32, #tpu.memory_space<vmem>>, vector<8x128xf32>,
    return
  }
}

</mosaic_0001>

<bundles_post_ra>
// kernel: tpu_custom_call.1
= control target key start
LH: loop header
LB: loop body
LE: loop exit
PB: predicated region body
PF: predicated region fallthrough
CT: control target
= control target key end

     0   :  { %6 = vsyncpa [#allocation3], 0  ;;  %s106_s0 = inlined_call_operand.hbm [shape: f32[8,128], index: 0, kind: input, shape index: {}]   ;;  %s107_s1 = inlined_call_operand.hbm [shape: f32[8,128], index: 1, kind: output, shape index: {}]  }
   0x1   :  { %7 = vsyncpa [#allocation4], 0  ;;  %s87_s6 = smov [#allocation2]  }
   0x2   :  { %s14_s7 = sshll.u32 %s87_s6, 4  ;;  %s15_s7 = int_to_ptr.vmem [resolvable:$true] %s14_s7 }
   0x3   :  { %s51_s8 = scalar_lea.vmem %s15_s7, 128  ;;  %p56_p1 = scmp.lt.s32.totalorder %s15_s7, %s15_s7 }
   0x4   :  { %p52_p0 = scmp.ne.s32.totalorder %s15_s7, %s51_s8  ;;  %p57_p2 = scmp.lt.s32.totalorder %s51_s8, %s51_s8 }
   0x6   :  { %p58_p3 = por %p57_p2, %p56_p1 }
   0x8   :  { %p59_p4 = pnand %p58_p3, %p52_p0 }
   0xa   :  { %62 = shalt.err (!%p59_p4)
}
   0xb   :  { %17 = dma.hbm_to_vmem [thread:$0]  %s106_s0, 128, %s15_s7, [#allocation3]  }
   0xc   :  { %83 = dma.done.wait [#allocation3], 128  }
   0xd   :  { %84 = vsyncadd [#allocation3], 4294967168  ;;  %v21_v0 = vld [vmem:[#allocation2] sm:$0xff]  ;;  %s88_s11 = smov 1   ;;  %s89_s12 = smov [#allocation5]  }
   0xe   :  { %22 = vrot.lane.b32.xlu0 %v21_v0, %s88_s11  ;;  %s31_s13 = sshll.u32 %s89_s12, 4  ;;  %s32_s13 = int_to_ptr.vmem [resolvable:$true] %s31_s13 }
   0xf   :  { %s63_s14 = scalar_lea.vmem %s32_s13, 128  ;;  %p68_p6 = scmp.lt.s32.totalorder %s32_s13, %s32_s13 }
  0x10   :  { %p64_p5 = scmp.ne.s32.totalorder %s32_s13, %s63_s14  ;;  %p69_p7 = scmp.lt.s32.totalorder %s63_s14, %s63_s14 }
  0x12   :  { %p70_p8 = por %p69_p7, %p68_p6 }
  0x14   :  { %p71_p9 = pnand %p70_p8, %p64_p5 }
  0x80   :  { %v23_v1 = vpop.permute.xlu0 %22 }
  0x81   :  { %24 = vst [vmem:[#allocation5] sm:$0xff] %v23_v1 }
  0x82   :  { %74 = shalt.err (!%p71_p9)
}
  0x83   :  { %34 = dma.vmem_to_hbm [thread:$0]  %s32_s13, 128, %s107_s1, [#allocation4]  }
  0x84   :  { %85 = dma.done.wait [#allocation4], 128  }
  0x85   :  { %86 = vsyncadd [#allocation4], 4294967168 }
  0x86   :  { %38 = vsyncpa [#allocation3], 1 }
  0x87   :  { %39 = vsyncpa [#allocation4], 1 }

</bundles_post_ra>
